<compile_context>
chip_gen: v7x
topology: tpu7x:2x2x1
jax: 0.10.0
libtpu: 0.0.40
codegen_flags: <defaults>
</compile_context>

<pallas_src>
import functools

import jax
import jax.numpy as jnp
from jax.experimental import pallas as pl
from jax.experimental.pallas import tpu as pltpu


_VMEM_LIMIT_BYTES = 32 * 1024 * 1024   # safe scoped-VMEM request on v5e/v6e/v7x
_X_BLOCK_BUDGET = 4 * 1024 * 1024      # bytes per x block (x4 buffers < 16 MiB)


# ---------------------------------------------------------------------------
# Pass 1: squeeze — spatial sum per (B, C), accumulated across HW tiles.
# ---------------------------------------------------------------------------
def _squeeze_kernel(x_ref, sum_ref):
    # x_ref: (TB, C, THW); sum_ref: (TB, C, 1) f32, resident across the HW axis.
    @pl.when(pl.program_id(1) == 0)
    def _():
        sum_ref[...] = jnp.zeros_like(sum_ref)

    sum_ref[...] += jnp.sum(x_ref[...].astype(jnp.float32), axis=-1,
                            keepdims=True)


# ---------------------------------------------------------------------------
# Pass 2: excitation — tiny MLP, single call, everything resident in VMEM.
# Weights arrive pre-transposed (w1t: (C, Cr), w2t: (Cr, C)).
# ---------------------------------------------------------------------------
def _excite_kernel(s_ref, w1t_ref, b1_ref, w2t_ref, b2_ref, g_ref):
    s = s_ref[...]                                               # (B, C) f32
    h = jnp.dot(s, w1t_ref[...],
                preferred_element_type=jnp.float32) + b1_ref[...]
    h = jnp.maximum(h, 0.0)                                      # ReLU
    g = jnp.dot(h, w2t_ref[...],
                preferred_element_type=jnp.float32) + b2_ref[...]
    g_ref[...] = jax.nn.sigmoid(g).astype(g_ref.dtype)           # (B, C)


# ---------------------------------------------------------------------------
# Pass 3: scale — the HBM-bandwidth-bound hot loop (load, multiply, store).
# ---------------------------------------------------------------------------
def _scale_kernel(x_ref, g_ref, o_ref):
    # g_ref: (TB, C, 1) broadcasts over the THW lane axis.
    o_ref[...] = x_ref[...] * g_ref[...]


def _choose_tiles(B, C, HW_pad, itemsize):
    """Pick (TB, THW) so one x block stays within the per-block byte budget."""
    max_elems = max(_X_BLOCK_BUDGET // itemsize, C * 128)
    n_chunks = HW_pad // 128
    thw = 128
    for d in range(1, n_chunks + 1):
        if n_chunks % d == 0 and C * d * 128 <= max_elems:
            thw = d * 128
    tb = 1
    for d in range(1, B + 1):
        if B % d == 0 and d * C * thw <= max_elems:
            tb = d
    return tb, thw


@functools.partial(jax.jit, static_argnums=())
def se_block(x_nchw, w1, b1, w2, b2):
    """SE block forward. x_nchw: (B, C, H, W)."""
    B, C, H, W = x_nchw.shape
    HW = H * W
    dtype = x_nchw.dtype
    itemsize = jnp.dtype(dtype).itemsize

    # Flatten spatial dims; pad HW to a multiple of 128 for lane-dense stores.
    HW_pad = ((HW + 127) // 128) * 128
    x_flat = x_nchw.reshape(B, C, HW)
    if HW_pad != HW:
        x_flat = jnp.pad(x_flat, ((0, 0), (0, 0), (0, HW_pad - HW)))

    TB, THW = _choose_tiles(B, C, HW_pad, itemsize)
    grid = (B // TB, HW_pad // THW)
    x_spec = pl.BlockSpec((TB, C, THW), lambda b, s: (b, 0, s))
    g_spec = pl.BlockSpec((TB, C, 1), lambda b, s: (b, 0, 0))

    # ---- pass 1: per-(B, C) spatial sum (padded zeros do not affect it) ----
    sums = pl.pallas_call(
        _squeeze_kernel,
        out_shape=jax.ShapeDtypeStruct((B, C, 1), jnp.float32),
        grid=grid,
        in_specs=[x_spec],
        out_specs=g_spec,
        compiler_params=pltpu.CompilerParams(
            dimension_semantics=("parallel", "arbitrary"),
            vmem_limit_bytes=_VMEM_LIMIT_BYTES),
    )(x_flat)
    mean = sums[:, :, 0] * (1.0 / HW)       # finish mean: sum * (1/HW)

    # ---- pass 2: tiny excitation MLP (single call, full arrays in VMEM) ----
    vmem = pl.BlockSpec(memory_space=pltpu.MemorySpace.VMEM)
    gate = pl.pallas_call(
        _excite_kernel,
        out_shape=jax.ShapeDtypeStruct((B, C), dtype),
        in_specs=[vmem] * 5,
        out_specs=vmem,
        compiler_params=pltpu.CompilerParams(
            vmem_limit_bytes=_VMEM_LIMIT_BYTES),
    )(mean, w1.T, b1.reshape(1, -1), w2.T, b2.reshape(1, -1))

    # ---- pass 3: broadcast-multiply at HBM roofline -------------------------
    out_flat = pl.pallas_call(
        _scale_kernel,
        out_shape=jax.ShapeDtypeStruct((B, C, HW_pad), dtype),
        grid=grid,
        in_specs=[x_spec, g_spec],
        out_specs=x_spec,
        compiler_params=pltpu.CompilerParams(
            dimension_semantics=("parallel", "parallel"),
            vmem_limit_bytes=_VMEM_LIMIT_BYTES),
    )(x_flat, gate.reshape(B, C, 1))

    if HW_pad != HW:
        out_flat = out_flat[:, :, :HW]
    return out_flat.reshape(B, C, H, W)


def init_se_params(key, num_channels, ratio_reduce):
    """Deterministic nn.Linear-style init for fc1/fc2."""
    num_channels_reduce = num_channels // ratio_reduce
    k1, k2, k3, k4 = jax.random.split(key, 4)
    bound1 = 1.0 / jnp.sqrt(num_channels)
    w1 = jax.random.uniform(k1, (num_channels_reduce, num_channels),
                            jnp.float32, -bound1, bound1)
    b1 = jax.random.uniform(k2, (num_channels_reduce,),
                            jnp.float32, -bound1, bound1)
    bound2 = 1.0 / jnp.sqrt(num_channels_reduce)
    w2 = jax.random.uniform(k3, (num_channels, num_channels_reduce),
                            jnp.float32, -bound2, bound2)
    b2 = jax.random.uniform(k4, (num_channels,),
                            jnp.float32, -bound2, bound2)
    return w1, b1, w2, b2


def se_block_ref(x, w1, b1, w2, b2):
    """Pure-JAX reference for verification."""
    squeeze = x.reshape(x.shape[0], x.shape[1], -1).mean(axis=2)
    h = jnp.maximum(squeeze @ w1.T + b1, 0.0)
    g = jax.nn.sigmoid(h @ w2.T + b2)
    return x * g[:, :, None, None]


if __name__ == "__main__":
    B, C, H, W = 2, 4, 16, 16
    ratio_reduce = 2

    key = jax.random.PRNGKey(0)
    kx, kp = jax.random.split(key)
    x = jax.random.normal(kx, (B, C, H, W), dtype=jnp.float32)
    w1, b1, w2, b2 = init_se_params(kp, C, ratio_reduce)

    out = jax.block_until_ready(se_block(x, w1, b1, w2, b2))
    ref = se_block_ref(x, w1, b1, w2, b2)

    assert out.shape == (B, C, H, W)
    assert jnp.allclose(out, ref, atol=1e-5, rtol=1e-5), "mismatch vs reference"

    print("KERNEL_OK")
</pallas_src>

<mosaic_0001>
module attributes {stable_mosaic.version = 11 : i64} {
  func.func @_squeeze_kernel(%arg0: i32, %arg1: i32, %arg2: memref<2x4x256xf32, #tpu.memory_space<vmem>>, %arg3: memref<2x4x1xf32, #tpu.memory_space<vmem>>) attributes {dimension_semantics = [#tpu.dimension_semantics<parallel>, #tpu.dimension_semantics<arbitrary>], iteration_bounds = array<i64: 1, 1>, scalar_prefetch = 0 : i64, scratch_operands = 0 : i64, tpu.core_type = #tpu.core_type<tc>, window_params = [{transform_indices = @transform_0, window_bounds = array<i64: 2, 4, 256>}, {transform_indices = @transform_1, window_bounds = array<i64: 2, 4, 1>}]} {
    %c0_i32 = arith.constant 0 : i32
    %0 = arith.cmpi eq, %arg1, %c0_i32 : i32
    %1 = arith.extui %0 : i1 to i32
    %c0_i32_0 = arith.constant 0 : i32
    %2 = arith.cmpi ne, %1, %c0_i32_0 : i32
    scf.if %2 {
      %cst_9 = arith.constant 0.000000e+00 : f32
      %9 = vector.broadcast %cst_9 : f32 to vector<2x4x1xf32>
      %c0_10 = arith.constant 0 : index
      %c0_11 = arith.constant 0 : index
      %c0_12 = arith.constant 0 : index
      %10 = vector.load %arg3[%c0_10, %c0_11, %c0_12] : memref<2x4x1xf32, #tpu.memory_space<vmem>>, vector<2x4x1xf32>
      tpu.vector_store %arg3[%c0_10, %c0_11, %c0_12], %9 {strides = array<i32>} : memref<2x4x1xf32, #tpu.memory_space<vmem>>, vector<2x4x1xf32>,
    } else {
    }
    %c0 = arith.constant 0 : index
    %c0_1 = arith.constant 0 : index
    %c0_2 = arith.constant 0 : index
    %3 = vector.load %arg3[%c0, %c0_1, %c0_2] : memref<2x4x1xf32, #tpu.memory_space<vmem>>, vector<2x4x1xf32>
    %c0_3 = arith.constant 0 : index
    %c0_4 = arith.constant 0 : index
    %c0_5 = arith.constant 0 : index
    %4 = vector.load %arg2[%c0_3, %c0_4, %c0_5] : memref<2x4x256xf32, #tpu.memory_space<vmem>>, vector<2x4x256xf32>
    %cst = arith.constant dense<0.000000e+00> : vector<2x4xf32>
    %5 = vector.multi_reduction <add>, %4, %cst [2] : vector<2x4x256xf32> to vector<2x4xf32>
    %6 = vector.shape_cast %5 : vector<2x4xf32> to vector<2x4x1xf32>
    %7 = arith.addf %3, %6 : vector<2x4x1xf32>
    %c0_6 = arith.constant 0 : index
    %c0_7 = arith.constant 0 : index
    %c0_8 = arith.constant 0 : index
    %8 = vector.load %arg3[%c0_6, %c0_7, %c0_8] : memref<2x4x1xf32, #tpu.memory_space<vmem>>, vector<2x4x1xf32>
    tpu.vector_store %arg3[%c0_6, %c0_7, %c0_8], %7 {strides = array<i32>} : memref<2x4x1xf32, #tpu.memory_space<vmem>>, vector<2x4x1xf32>,
    return
  }
  func.func @transform_0(%arg0: i32, %arg1: i32) -> (i32, i32, i32) {
    %c0_i32 = arith.constant 0 : i32
    %c0_i32_0 = arith.constant 0 : i32
    return %arg0, %c0_i32, %arg1 : i32, i32, i32
  }
  func.func @transform_1(%arg0: i32, %arg1: i32) -> (i32, i32, i32) {
    %c0_i32 = arith.constant 0 : i32
    %c0_i32_0 = arith.constant 0 : i32
    %c0_i32_1 = arith.constant 0 : i32
    return %arg0, %c0_i32, %c0_i32_0 : i32, i32, i32
  }
}

module attributes {stable_mosaic.version = 11 : i64} {
  func.func @_scale_kernel(%arg0: i32, %arg1: i32, %arg2: memref<2x4x256xf32, #tpu.memory_space<vmem>>, %arg3: memref<2x4x1xf32, #tpu.memory_space<vmem>>, %arg4: memref<2x4x256xf32, #tpu.memory_space<vmem>>) attributes {dimension_semantics = [#tpu.dimension_semantics<parallel>, #tpu.dimension_semantics<parallel>], iteration_bounds = array<i64: 1, 1>, scalar_prefetch = 0 : i64, scratch_operands = 0 : i64, tpu.core_type = #tpu.core_type<tc>, window_params = [{transform_indices = @transform_0, window_bounds = array<i64: 2, 4, 256>}, {transform_indices = @transform_1, window_bounds = array<i64: 2, 4, 1>}, {transform_indices = @transform_2, window_bounds = array<i64: 2, 4, 256>}]} {
    %c0 = arith.constant 0 : index
    %c0_0 = arith.constant 0 : index
    %c0_1 = arith.constant 0 : index
    %0 = vector.load %arg2[%c0, %c0_0, %c0_1] : memref<2x4x256xf32, #tpu.memory_space<vmem>>, vector<2x4x256xf32>
    %c0_2 = arith.constant 0 : index
    %c0_3 = arith.constant 0 : index
    %c0_4 = arith.constant 0 : index
    %1 = vector.load %arg3[%c0_2, %c0_3, %c0_4] : memref<2x4x1xf32, #tpu.memory_space<vmem>>, vector<2x4x1xf32>
    %2 = vector.broadcast %1 : vector<2x4x1xf32> to vector<2x4x256xf32>
    %3 = arith.mulf %0, %2 : vector<2x4x256xf32>
    %c0_5 = arith.constant 0 : index
    %c0_6 = arith.constant 0 : index
    %c0_7 = arith.constant 0 : index
    %4 = vector.load %arg4[%c0_5, %c0_6, %c0_7] : memref<2x4x256xf32, #tpu.memory_space<vmem>>, vector<2x4x256xf32>
    tpu.vector_store %arg4[%c0_5, %c0_6, %c0_7], %3 {strides = array<i32>} : memref<2x4x256xf32, #tpu.memory_space<vmem>>, vector<2x4x256xf32>,
    return
  }
  func.func @transform_0(%arg0: i32, %arg1: i32) -> (i32, i32, i32) {
    %c0_i32 = arith.constant 0 : i32
    %c0_i32_0 = arith.constant 0 : i32
    return %arg0, %c0_i32, %arg1 : i32, i32, i32
  }
  func.func @transform_1(%arg0: i32, %arg1: i32) -> (i32, i32, i32) {
    %c0_i32 = arith.constant 0 : i32
    %c0_i32_0 = arith.constant 0 : i32
    %c0_i32_1 = arith.constant 0 : i32
    return %arg0, %c0_i32, %c0_i32_0 : i32, i32, i32
  }
  func.func @transform_2(%arg0: i32, %arg1: i32) -> (i32, i32, i32) {
    %c0_i32 = arith.constant 0 : i32
    %c0_i32_0 = arith.constant 0 : i32
    return %arg0, %c0_i32, %arg1 : i32, i32, i32
  }
}

module attributes {stable_mosaic.version = 11 : i64} {
  func.func @_excite_kernel(%arg0: memref<2x4xf32, #tpu.memory_space<vmem>>, %arg1: memref<4x2xf32, #tpu.memory_space<vmem>>, %arg2: memref<1x2xf32, #tpu.memory_space<vmem>>, %arg3: memref<2x4xf32, #tpu.memory_space<vmem>>, %arg4: memref<1x4xf32, #tpu.memory_space<vmem>>, %arg5: memref<2x4xf32, #tpu.memory_space<vmem>>) attributes {dimension_semantics = [], scalar_prefetch = 0 : i64, scratch_operands = 0 : i64, tpu.core_type = #tpu.core_type<tc>} {
    %c0 = arith.constant 0 : index
    %c0_0 = arith.constant 0 : index
    %0 = vector.load %arg0[%c0, %c0_0] : memref<2x4xf32, #tpu.memory_space<vmem>>, vector<2x4xf32>
    %c0_1 = arith.constant 0 : index
    %c0_2 = arith.constant 0 : index
    %1 = vector.load %arg1[%c0_1, %c0_2] : memref<4x2xf32, #tpu.memory_space<vmem>>, vector<4x2xf32>
    %cst = arith.constant dense<0.000000e+00> : vector<2x2xf32>
    %2 = tpu.matmul %0, %1, %cst {dimension_numbers = #tpu.dot_dimension_numbers<[1], [0], [0], [1], [0, 0, 1, 1], [], []>} : vector<2x4xf32>, vector<4x2xf32>, vector<2x2xf32> -> vector<2x2xf32>
    %c0_3 = arith.constant 0 : index
    %c0_4 = arith.constant 0 : index
    %3 = vector.load %arg2[%c0_3, %c0_4] : memref<1x2xf32, #tpu.memory_space<vmem>>, vector<1x2xf32>
    %4 = vector.broadcast %3 : vector<1x2xf32> to vector<2x2xf32>
    %5 = arith.addf %2, %4 : vector<2x2xf32>
    %cst_5 = arith.constant 0.000000e+00 : f32
    %6 = vector.broadcast %cst_5 : f32 to vector<2x2xf32>
    %7 = arith.maximumf %5, %6 : vector<2x2xf32>
    %c0_6 = arith.constant 0 : index
    %c0_7 = arith.constant 0 : index
    %8 = vector.load %arg3[%c0_6, %c0_7] : memref<2x4xf32, #tpu.memory_space<vmem>>, vector<2x4xf32>
    %cst_8 = arith.constant dense<0.000000e+00> : vector<2x4xf32>
    %9 = tpu.matmul %7, %8, %cst_8 {dimension_numbers = #tpu.dot_dimension_numbers<[1], [0], [0], [1], [0, 0, 1, 1], [], []>} : vector<2x2xf32>, vector<2x4xf32>, vector<2x4xf32> -> vector<2x4xf32>
    %c0_9 = arith.constant 0 : index
    %c0_10 = arith.constant 0 : index
    %10 = vector.load %arg4[%c0_9, %c0_10] : memref<1x4xf32, #tpu.memory_space<vmem>>, vector<1x4xf32>
    %11 = vector.broadcast %10 : vector<1x4xf32> to vector<2x4xf32>
    %12 = arith.addf %9, %11 : vector<2x4xf32>
    %13 = arith.negf %12 : vector<2x4xf32>
    %14 = math.exp %13 : vector<2x4xf32>
    %cst_11 = arith.constant 1.000000e+00 : f32
    %15 = vector.broadcast %cst_11 : f32 to vector<2x4xf32>
    %16 = arith.addf %15, %14 : vector<2x4xf32>
    %17 = arith.divf %15, %16 : vector<2x4xf32>
    %c0_12 = arith.constant 0 : index
    %c0_13 = arith.constant 0 : index
    %18 = vector.load %arg5[%c0_12, %c0_13] : memref<2x4xf32, #tpu.memory_space<vmem>>, vector<2x4xf32>
    tpu.vector_store %arg5[%c0_12, %c0_13], %17 {strides = array<i32>} : memref<2x4xf32, #tpu.memory_space<vmem>>, vector<2x4xf32>,
    return
  }
}

</mosaic_0001>

<bundles_post_ra>
// kernel: se_block.5
= control target key start
LH: loop header
LB: loop body
LE: loop exit
PB: predicated region body
PF: predicated region fallthrough
CT: control target
= control target key end

     0   :  { %v50_v0 = vmov 0   ;;  %v51_v3 = vmov 839922192   ;;  %v26_v5 = vlaneseq  ;;  %s85_s1 = inlined_call_operand.vmem [shape: f32[2,4,1], index: 1, kind: input, shape index: {}]   ;;  %s86_s0 = inlined_call_operand.vmem [shape: f32[2,4,256], index: 0, kind: input, shape index: {}]   ;;  %s87_s2 = inlined_call_operand.vmem [shape: f32[2,4,256], index: 2, kind: output, shape index: {}]  }
   0x1   :  { %49 = vset.pattern.permute.xlu0 %v50_v0  ;;  %v13_v1 = vld [vmem:[%s85_s1] sm:$0xf]  ;;  %v14_v2 = vld [vmem:[%s85_s1 + $0x4] sm:$0xf]  ;;  %v24_v4 = vunpack.c.l.s4 %v51_v3  ;;  %v12_v14 = vld [vmem:[%s86_s0 + $0x8] sm:$0xff] }
   0x2   :  { %17 = vperm.xlu0 %49, %v13_v1   ;;  %v27_v7 = vshrl.u32 %v26_v5, 7  ;;  %v11_v10 = vld [vmem:[%s86_s0] sm:$0xff] }
   0x3   :  { %v25_v6 = vunpack.c.0.s8 %v24_v4 }
   0x5   :  { %v28_v8 = vsub.s32 %v25_v6, %v27_v7 }
   0x6   :  { %21 = vperm.xlu0 %49, %v14_v2  }
  0x81   :  { %v18_v9 = vpop.permute.xlu0 %17 }
  0x82   :  { %v29_v11 = vrot.slane %v18_v9, %v28_v8 }
  0x84   :  { %v39_v12 = vmul.f32 %v29_v11, %v11_v10 }
  0x85   :  { %v22_v13 = vpop.permute.xlu0 %21 }
  0x86   :  { %41 = vst [vmem:[%s87_s2] sm:$0xff] %v39_v12  ;;  %v36_v15 = vrot.slane %v22_v13, %v28_v8 }
  0x88   :  { %v40_v16 = vmul.f32 %v36_v15, %v12_v14 }
  0x8a   :  { %42 = vst [vmem:[%s87_s2 + $0x8] sm:$0xff] %v40_v16 }

// kernel: se_block.3
= control target key start
LH: loop header
LB: loop body
LE: loop exit
PB: predicated region body
PF: predicated region fallthrough
CT: control target
= control target key end

     0   :  { %vm25_vm0 = vcmask 1043456   ;;  %vm12_vm1 = vcmask 3072   ;;  %v48_v2 = vmov 0.0   ;;  %s87_s0 = inlined_call_operand.vmem [shape: f32[2,4,256], index: 0, kind: input, shape index: {}]   ;;  %s88_s1 = inlined_call_operand.vmem [shape: f32[2,4,1], index: 1, kind: output, shape index: {}]  }
   0x1   :  { %v17_v0 = vld [vmem:[%s87_s0] sm:$0xff]  ;;  %v18_v1 = vld [vmem:[%s87_s0 + $0x8] sm:$0xff]  ;;  %13 = vst.msk [vmem:[%s88_s1] sm:$0xf] %vm12_vm1, %v48_v2  ;;  %14 = vst.msk [vmem:[%s88_s1 + $0x4] sm:$0xf] %vm12_vm1, %v48_v2 }
   0x2   :  { %v21_v3 = vcombine.high %v17_v0, %v17_v0  ;;  %v26_v4 = vsel %vm25_vm0, %v17_v0, 0.0  ;;  %v22_v5 = vcombine.high %v18_v1, %v18_v1  ;;  %v31_v7 = vsel %vm25_vm0, %v18_v1, 0.0 }
   0x4   :  { %v27_v6 = vsel %vm25_vm0, %v21_v3, 0.0  ;;  %v32_v8 = vsel %vm25_vm0, %v22_v5, 0.0 }
   0x5   :  { %v28_v9 = vadd.f32 %v27_v6, %v26_v4  ;;  %v33_v10 = vadd.f32 %v32_v8, %v31_v7 }
   0x7   :  { %29 = vadd.xlane.f32.xlu0 %v28_v9 }
   0x8   :  { %v15_v11 = vld [vmem:[%s88_s1] sm:$0xf]  ;;  %v16_v14 = vld [vmem:[%s88_s1 + $0x4] sm:$0xf] }
   0xb   :  { %34 = vadd.xlane.f32.xlu0 %v33_v10 }
  0x94   :  { %v30_v12 = vpop.xlane.xlu0 %29 }
  0x95   :  { %v36_v13 = vadd.f32 %v30_v12, %v15_v11 }
  0x97   :  { %39 = vst.msk [vmem:[%s88_s1] sm:$0xf] %vm12_vm1, %v36_v13 }
  0x98   :  { %v35_v15 = vpop.xlane.xlu0 %34 }
  0x99   :  { %v37_v16 = vadd.f32 %v35_v15, %v16_v14 }
  0x9b   :  { %40 = vst.msk [vmem:[%s88_s1 + $0x4] sm:$0xf] %vm12_vm1, %v37_v16 }

// kernel: se_block.4
= control target key start
LH: loop header
LB: loop body
LE: loop exit
PB: predicated region body
PF: predicated region fallthrough
CT: control target
= control target key end

     0   :  { %vm33_vm0 = vcmask 1043456   ;;  %vm29_vm1 = vcmask 31744   ;;  %v233_v0 = vmov 0.0   ;;  %vm234_vm2 = vmmov 0   ;;  %s283_s1 = inlined_call_operand.vmem [shape: f32[4,2], index: 1, kind: input, shape index: {}]   ;;  %s284_s0 = inlined_call_operand.vmem [shape: f32[2,4], index: 0, kind: input, shape index: {}]   ;;  %s285_s3 = inlined_call_operand.vmem [shape: f32[2,4], index: 3, kind: input, shape index: {}]   ;;  %s286_s2 = inlined_call_operand.vmem [shape: f32[1,2], index: 2, kind: input, shape index: {}]   ;;  %s287_s4 = inlined_call_operand.vmem [shape: f32[1,4], index: 4, kind: input, shape index: {}]   ;;  %s288_s5 = inlined_call_operand.vmem [shape: f32[2,4], index: 5, kind: output, shape index: {}]  }
   0x1   :  { %217 = vmatprep.subr.mxu0 %v233_v0  ;;  %v21_v1 = vld [vmem:[%s283_s1] sm:$0xf]  ;;  %219 = vmatprep.mubr.msk.f32.mxu0 %vm234_vm2, %v233_v0  ;;  %vm120_vm3 = vcmask 1041408   ;;  %vm116_vm4 = vcmask 15360   ;;  %vm200_vm5 = vcmask 25600  }
   0x2   :  { %v20_v2 = vld [vmem:[%s284_s0] sm:$0x3]  ;;  %218 = vmatpush3.msk.msra.mxu0 %vm33_vm0, %v21_v1  ;;  %222 = vmatprep.subr.mxu1 %v233_v0 }
   0x3   :  { %220 = vmatmul.mubr.msk.f32.vlgmr.msra.gmra.mrb[0].mxu0 %vm29_vm1, %v20_v2  ;;  %224 = vmatprep.mubr.msk.f32.mxu1 %vm234_vm2, %v233_v0  ;;  %v108_v3 = vld [vmem:[%s285_s3] sm:$0x3] }
   0x4   :  { %223 = vmatpush3.msk.msra.mxu1 %vm120_vm3, %v108_v3  ;;  %v206_v4 = vld [vmem:[%s286_s2] ss:$0 sm:$0xff] }
   0x5   :  { %v209_v9 = vld [vmem:[%s287_s4] ss:$0 sm:$0xff] }
  0xd6   :  { %v103_v5 = vpop.f32.mrb[0].mxu0 }
  0xd7   :  { %v104_v6 = vadd.f32 %v206_v4, %v103_v5  ;;  %v221_v7 = vpop.f32.mrb[1].mxu0 }
  0xd9   :  { %v107_v8 = vmax.f32 %v104_v6, 0.0 }
  0xdb   :  { %225 = vmatmul.mubr.msk.f32.vlgmr.msra.gmra.mrb[0].mxu1 %vm116_vm4, %v107_v8 }
 0x1ae   :  { %v190_v10 = vpop.f32.mrb[0].mxu1 }
 0x1af   :  { %v191_v11 = vadd.f32 %v209_v9, %v190_v10  ;;  %v226_v12 = vpop.f32.mrb[1].mxu1 }
 0x1b1   :  { %v212_v13 = vmul.f32 -1.442695, %v191_v11 }
 0x1b3   :  { %229 = vpow2.f32 %v212_v13 }
 0x1bd   :  { %v230_v14 = vpop.eup %229 }
 0x1be   :  { %v197_v15 = vadd.f32 1.0, %v230_v14 }
 0x1c0   :  { %231 = vrcp.f32 %v197_v15 }
 0x1ca   :  { %v232_v16 = vpop.eup %231 }
 0x1cb   :  { %201 = vst.msk [vmem:[%s288_s5] sm:$0x3] %vm200_vm5, %v232_v16 }

</bundles_post_ra>
